<compile_context>
chip_gen: v6e
topology: v6e:2x2x1
jax: 0.10.0
libtpu: 0.0.40
codegen_flags: <defaults>
</compile_context>

<pallas_src>
import jax
import jax.numpy as jnp
from jax.experimental import pallas as pl
from jax.experimental.pallas import tpu as pltpu


_VMEM_LIMIT_BYTES = 48 * 1024 * 1024   # < 64 MiB (v7x physical), < 128 MiB (v5e/v6e)
_TILE_BUDGET_BYTES = 28 * 1024 * 1024  # working-set budget used to derive bb


def _round_up(x, m):
    return ((x + m - 1) // m) * m


def _pick_bb(B, S, dim, ctx_itemsize):
    """VMEM-budgeted batch tile (multiple of 8, >=2 grid steps when possible)."""
    # Per batch-row VMEM cost (bytes), conservatively:
    #   context block, double-buffered by the pipeline : 2 * S * dim * itemsize
    #   f32 in-kernel temporaries (two (S,dim) products + f32 copy)
    #                                                  : 3 * S * dim * 4
    #   h / target / fused / wc / h_tilde / attn rows  : ~8 * dim * 4
    per_row = 2 * S * dim * ctx_itemsize + 3 * S * dim * 4 + 8 * dim * 4
    bb = max(8, (_TILE_BUDGET_BYTES // per_row) // 8 * 8)
    # Keep >= 2 grid steps so the 'parallel' axis can be sharded across both
    # v7x TensorCores (and across megacore on other chips).
    if B > 8:
        bb = min(bb, max(8, (B // 2) // 8 * 8))
    bb = min(bb, _round_up(B, 8))
    return bb


def _make_kernel(*, dim, masked):
    def kernel(h_ref, ctx_ref, *rest):
        if masked:
            mbias_ref, w_in_oh_ref, woc_ref, htilde_ref, attn_ref = rest
        else:
            w_in_oh_ref, woc_ref, htilde_ref, attn_ref = rest

        h = h_ref[...]                                # (bb, dim)
        ctx = ctx_ref[...]                            # (bb, S, dim), native dtype

        # Fused MXU matmul: h @ [win_t | woh] -> (bb, 2*dim), f32 accumulation.
        fused = jnp.dot(h, w_in_oh_ref[...],
                        preferred_element_type=jnp.float32)
        target = fused[:, :dim]                       # linear_in(h)
        h_woh = fused[:, dim:]                        # h @ woh (reused below)

        # Attention scores: per-batch matvec as broadcast-multiply (native
        # dtype, bf16 VALU on v6e/v7x) + lane reduce with f32 accumulation.
        tgt_c = target.astype(ctx.dtype)
        scores = jnp.sum((ctx * tgt_c[:, None, :]).astype(jnp.float32),
                         axis=-1)                     # (bb, S)
        if masked:
            scores = scores + mbias_ref[...]          # additive 0 / -inf bias

        # Softmax over the sequence axis. Reciprocal on the EUP slot; one
        # Newton step on the tiny (bb,1) denominator restores f32 accuracy.
        m = jnp.max(scores, axis=-1, keepdims=True)
        e = jnp.exp(scores - m)
        denom = jnp.sum(e, axis=-1, keepdims=True)
        inv = pl.reciprocal(denom, approx=True)
        inv = inv * (2.0 - denom * inv)
        attn = e * inv                                # (bb, S) f32
        attn_ref[...] = attn.astype(attn_ref.dtype)

        # weighted_context: broadcast-multiply + sublane reduce over S,
        # f32 accumulation.
        attn_c = attn.astype(ctx.dtype)
        wc = jnp.sum((attn_c[:, :, None] * ctx).astype(jnp.float32),
                     axis=1)                          # (bb, dim)

        # h_tilde = tanh([wc ; h] @ Wout^T) == tanh(wc @ woc + h @ woh)
        ht = jnp.dot(wc.astype(woc_ref.dtype), woc_ref[...],
                     preferred_element_type=jnp.float32) + h_woh
        htilde_ref[...] = jnp.tanh(ht).astype(htilde_ref.dtype)

    return kernel


def soft_dot_attention(h, context, win_t, woc, woh, mask=None, *, bb=None):
    """h: (B, dim), context: (B, S, dim) -> (h_tilde (B, dim), attn (B, S) f32).

    NOTE: a fully-masked row yields NaN attention (same as torch
    masked_fill(-inf) + softmax).
    """
    B, dim = h.shape
    _, S, _ = context.shape

    if bb is None:
        bb = _pick_bb(B, S, dim, jnp.dtype(context.dtype).itemsize)
    bb = max(8, min(bb, _round_up(B, 8)))
    grid = (pl.cdiv(B, bb),)

    # Fuse the two matmuls that share LHS h into one (dim, 2*dim) weight.
    w_in_oh = jnp.concatenate([win_t, woh], axis=1)   # (dim, 2*dim)

    masked = mask is not None
    in_specs = [
        pl.BlockSpec((bb, dim), lambda i: (i, 0)),
        pl.BlockSpec((bb, S, dim), lambda i: (i, 0, 0)),
    ]
    inputs = [h, context]
    if masked:
        # masked_fill_(mask, -inf) before softmax -> additive -inf bias.
        mask_bias = jnp.where(mask, -jnp.inf, 0.0).astype(jnp.float32)
        in_specs.append(pl.BlockSpec((bb, S), lambda i: (i, 0)))
        inputs.append(mask_bias)
    # Grid-invariant weights (tiny at dim=128; for very large dim consider
    # pipeline_mode=pl.Buffered(1) to avoid double-buffering them).
    in_specs += [
        pl.BlockSpec((dim, 2 * dim), lambda i: (0, 0)),
        pl.BlockSpec((dim, dim), lambda i: (0, 0)),
    ]
    inputs += [w_in_oh, woc]

    out_shape = (
        jax.ShapeDtypeStruct((B, dim), h.dtype),
        jax.ShapeDtypeStruct((B, S), jnp.float32),    # torch returns f32 attn
    )

    # TODO(synk): for very large S, add a second "arbitrary" grid axis over S
    # with online-softmax accumulation instead of shrinking bb.
    return pl.pallas_call(
        _make_kernel(dim=dim, masked=masked),
        out_shape=out_shape,
        grid_spec=pltpu.PrefetchScalarGridSpec(
            num_scalar_prefetch=0,
            grid=grid,
            in_specs=in_specs,
            out_specs=[
                pl.BlockSpec((bb, dim), lambda i: (i, 0)),
                pl.BlockSpec((bb, S), lambda i: (i, 0)),
            ],
        ),
        compiler_params=pltpu.CompilerParams(
            dimension_semantics=("parallel",),
            vmem_limit_bytes=_VMEM_LIMIT_BYTES,
        ),
    )(*inputs)


def _reference(h, context, win_t, woc, woh, mask=None):
    target = h @ win_t                                      # (B, dim)
    attn = jnp.einsum('bsd,bd->bs', context, target)        # (B, S)
    if mask is not None:
        attn = jnp.where(mask, -jnp.inf, attn)
    attn = jax.nn.softmax(attn, axis=1)
    wc = jnp.einsum('bs,bsd->bd', attn, context)            # (B, dim)
    wout_t = jnp.concatenate([woc, woh], axis=0)            # (2*dim, dim)
    h_tilde = jnp.tanh(jnp.concatenate([wc, h], axis=1) @ wout_t)
    return h_tilde, attn


if __name__ == "__main__":
    # Small deterministic shapes: batch 16, seq 8, hidden 128 (lane-dense dim,
    # sublane-aligned batch tile, 2 parallel grid steps).
    B, S, dim = 16, 8, 128

    key = jax.random.PRNGKey(0)
    k = jax.random.split(key, 6)
    h = jax.random.normal(k[0], (B, dim), dtype=jnp.float32)
    context = jax.random.normal(k[1], (B, S, dim), dtype=jnp.float32)

    # Synthetic (deterministic) weights, pre-transposed / pre-split.
    win_t = jax.random.normal(k[2], (dim, dim), dtype=jnp.float32) * 0.05
    woc = jax.random.normal(k[3], (dim, dim), dtype=jnp.float32) * 0.05
    woh = jax.random.normal(k[4], (dim, dim), dtype=jnp.float32) * 0.05

    # --- unmasked path (no mask-bias DMA) ---
    h_tilde, attn = soft_dot_attention(h, context, win_t, woc, woh, mask=None)
    h_tilde = jax.block_until_ready(h_tilde)
    attn = jax.block_until_ready(attn)

    ref_ht, ref_attn = _reference(h, context, win_t, woc, woh, mask=None)
    assert h_tilde.shape == (B, dim) and attn.shape == (B, S)
    assert jnp.allclose(attn, ref_attn, atol=2e-5, rtol=1e-4)
    assert jnp.allclose(h_tilde, ref_ht, atol=1e-4, rtol=1e-4)

    # --- masked path (every row keeps at least one unmasked position) ---
    mask = jax.random.uniform(k[5], (B, S)) < 0.3
    mask = mask.at[:, 0].set(False)
    h_tilde_m, attn_m = soft_dot_attention(h, context, win_t, woc, woh, mask=mask)
    h_tilde_m = jax.block_until_ready(h_tilde_m)
    attn_m = jax.block_until_ready(attn_m)

    ref_ht_m, ref_attn_m = _reference(h, context, win_t, woc, woh, mask=mask)
    assert jnp.allclose(attn_m, ref_attn_m, atol=2e-5, rtol=1e-4)
    assert jnp.allclose(h_tilde_m, ref_ht_m, atol=1e-4, rtol=1e-4)

    print("KERNEL_OK")
</pallas_src>

<mosaic_0001>
module attributes {stable_mosaic.version = 11 : i64} {
  func.func @kernel(%arg0: i32, %arg1: memref<8x128xf32, #tpu.memory_space<vmem>>, %arg2: memref<8x8x128xf32, #tpu.memory_space<vmem>>, %arg3: memref<128x256xf32, #tpu.memory_space<vmem>>, %arg4: memref<128x128xf32, #tpu.memory_space<vmem>>, %arg5: memref<8x128xf32, #tpu.memory_space<vmem>>, %arg6: memref<8x8xf32, #tpu.memory_space<vmem>>) attributes {dimension_semantics = [#tpu.dimension_semantics<parallel>], iteration_bounds = array<i64: 2>, scalar_prefetch = 0 : i64, scratch_operands = 0 : i64, tpu.core_type = #tpu.core_type<tc>, window_params = [{transform_indices = @transform_0, window_bounds = array<i64: 8, 128>}, {transform_indices = @transform_1, window_bounds = array<i64: 8, 8, 128>}, {pipeline_mode = #tpu.pipeline_mode<synchronous>, transform_indices = @transform_2, window_bounds = array<i64: 128, 256>}, {pipeline_mode = #tpu.pipeline_mode<synchronous>, transform_indices = @transform_3, window_bounds = array<i64: 128, 128>}, {transform_indices = @transform_4, window_bounds = array<i64: 8, 128>}, {transform_indices = @transform_5, window_bounds = array<i64: 8, 8>}]} {
    %c0 = arith.constant 0 : index
    %c0_0 = arith.constant 0 : index
    %0 = vector.load %arg1[%c0, %c0_0] : memref<8x128xf32, #tpu.memory_space<vmem>>, vector<8x128xf32>
    %c0_1 = arith.constant 0 : index
    %c0_2 = arith.constant 0 : index
    %c0_3 = arith.constant 0 : index
    %1 = vector.load %arg2[%c0_1, %c0_2, %c0_3] : memref<8x8x128xf32, #tpu.memory_space<vmem>>, vector<8x8x128xf32>
    %c0_4 = arith.constant 0 : index
    %c0_5 = arith.constant 0 : index
    %2 = vector.load %arg3[%c0_4, %c0_5] : memref<128x256xf32, #tpu.memory_space<vmem>>, vector<128x256xf32>
    %cst = arith.constant dense<0.000000e+00> : vector<8x256xf32>
    %3 = tpu.matmul %0, %2, %cst {dimension_numbers = #tpu.dot_dimension_numbers<[1], [0], [0], [1], [0, 0, 1, 1], [], []>} : vector<8x128xf32>, vector<128x256xf32>, vector<8x256xf32> -> vector<8x256xf32>
    %4 = vector.extract_strided_slice %3 {offsets = [0, 0], sizes = [8, 128], strides = [1, 1]} : vector<8x256xf32> to vector<8x128xf32>
    %5 = vector.extract_strided_slice %3 {offsets = [0, 128], sizes = [8, 128], strides = [1, 1]} : vector<8x256xf32> to vector<8x128xf32>
    %6 = vector.shape_cast %4 : vector<8x128xf32> to vector<8x1x128xf32>
    %7 = vector.broadcast %6 : vector<8x1x128xf32> to vector<8x8x128xf32>
    %8 = arith.mulf %1, %7 : vector<8x8x128xf32>
    %cst_6 = arith.constant dense<0.000000e+00> : vector<8x8xf32>
    %9 = vector.multi_reduction <add>, %8, %cst_6 [2] : vector<8x8x128xf32> to vector<8x8xf32>
    %cst_7 = arith.constant dense<0xFF800000> : vector<8xf32>
    %10 = vector.multi_reduction <maximumf>, %9, %cst_7 [1] : vector<8x8xf32> to vector<8xf32>
    %11 = vector.shape_cast %10 : vector<8xf32> to vector<8x1xf32>
    %12 = vector.broadcast %11 : vector<8x1xf32> to vector<8x8xf32>
    %13 = arith.subf %9, %12 : vector<8x8xf32>
    %14 = math.exp %13 : vector<8x8xf32>
    %cst_8 = arith.constant dense<0.000000e+00> : vector<8xf32>
    %15 = vector.multi_reduction <add>, %14, %cst_8 [1] : vector<8x8xf32> to vector<8xf32>
    %16 = vector.shape_cast %15 : vector<8xf32> to vector<8x1xf32>
    %17 = tpu.reciprocal %16 {approx = true} : vector<8x1xf32> -> vector<8x1xf32>
    %18 = arith.mulf %16, %17 : vector<8x1xf32>
    %cst_9 = arith.constant 2.000000e+00 : f32
    %19 = vector.broadcast %cst_9 : f32 to vector<8x1xf32>
    %20 = arith.subf %19, %18 : vector<8x1xf32>
    %21 = arith.mulf %17, %20 : vector<8x1xf32>
    %22 = vector.broadcast %21 : vector<8x1xf32> to vector<8x8xf32>
    %23 = arith.mulf %14, %22 : vector<8x8xf32>
    %c0_10 = arith.constant 0 : index
    %c0_11 = arith.constant 0 : index
    %24 = vector.load %arg6[%c0_10, %c0_11] : memref<8x8xf32, #tpu.memory_space<vmem>>, vector<8x8xf32>
    tpu.vector_store %arg6[%c0_10, %c0_11], %23 {strides = array<i32>} : memref<8x8xf32, #tpu.memory_space<vmem>>, vector<8x8xf32>,
    %25 = vector.shape_cast %23 : vector<8x8xf32> to vector<8x8x1xf32>
    %26 = vector.broadcast %25 : vector<8x8x1xf32> to vector<8x8x128xf32>
    %27 = arith.mulf %26, %1 : vector<8x8x128xf32>
    %cst_12 = arith.constant dense<0.000000e+00> : vector<8x128xf32>
    %28 = vector.multi_reduction <add>, %27, %cst_12 [1] : vector<8x8x128xf32> to vector<8x128xf32>
    %c0_13 = arith.constant 0 : index
    %c0_14 = arith.constant 0 : index
    %29 = vector.load %arg4[%c0_13, %c0_14] : memref<128x128xf32, #tpu.memory_space<vmem>>, vector<128x128xf32>
    %cst_15 = arith.constant dense<0.000000e+00> : vector<8x128xf32>
    %30 = tpu.matmul %28, %29, %cst_15 {dimension_numbers = #tpu.dot_dimension_numbers<[1], [0], [0], [1], [0, 0, 1, 1], [], []>} : vector<8x128xf32>, vector<128x128xf32>, vector<8x128xf32> -> vector<8x128xf32>
    %31 = arith.addf %30, %5 : vector<8x128xf32>
    %32 = math.tanh %31 : vector<8x128xf32>
    %c0_16 = arith.constant 0 : index
    %c0_17 = arith.constant 0 : index
    %33 = vector.load %arg5[%c0_16, %c0_17] : memref<8x128xf32, #tpu.memory_space<vmem>>, vector<8x128xf32>
    tpu.vector_store %arg5[%c0_16, %c0_17], %32 {strides = array<i32>} : memref<8x128xf32, #tpu.memory_space<vmem>>, vector<8x128xf32>,
    return
  }
  func.func @transform_0(%arg0: i32) -> (i32, i32) {
    %c0_i32 = arith.constant 0 : i32
    %c0_i32_0 = arith.constant 0 : i32
    return %arg0, %c0_i32 : i32, i32
  }
  func.func @transform_1(%arg0: i32) -> (i32, i32, i32) {
    %c0_i32 = arith.constant 0 : i32
    %c0_i32_0 = arith.constant 0 : i32
    %c0_i32_1 = arith.constant 0 : i32
    return %arg0, %c0_i32, %c0_i32_0 : i32, i32, i32
  }
  func.func @transform_2(%arg0: i32) -> (i32, i32) {
    %c0_i32 = arith.constant 0 : i32
    %c0_i32_0 = arith.constant 0 : i32
    %c0_i32_1 = arith.constant 0 : i32
    return %c0_i32, %c0_i32_0 : i32, i32
  }
  func.func @transform_3(%arg0: i32) -> (i32, i32) {
    %c0_i32 = arith.constant 0 : i32
    %c0_i32_0 = arith.constant 0 : i32
    %c0_i32_1 = arith.constant 0 : i32
    return %c0_i32, %c0_i32_0 : i32, i32
  }
  func.func @transform_4(%arg0: i32) -> (i32, i32) {
    %c0_i32 = arith.constant 0 : i32
    %c0_i32_0 = arith.constant 0 : i32
    return %arg0, %c0_i32 : i32, i32
  }
  func.func @transform_5(%arg0: i32) -> (i32, i32) {
    %c0_i32 = arith.constant 0 : i32
    %c0_i32_0 = arith.constant 0 : i32
    return %arg0, %c0_i32 : i32, i32
  }
}

</mosaic_0001>

<bundles_post_ra>
// kernel: tpu_custom_call.1
= control target key start
LH: loop header
LB: loop body
LE: loop exit
PB: predicated region body
PF: predicated region fallthrough
CT: control target
= control target key end

     0   :  { %s2035_s0 = inlined_call_operand.hbm [shape: f32[16,128], index: 0, kind: input, shape index: {}]   ;;  %s2036_s1 = inlined_call_operand.hbm [shape: f32[16,8,128], index: 1, kind: input, shape index: {}]   ;;  %s2037_s2 = inlined_call_operand.hbm [shape: f32[128,256], index: 2, kind: input, shape index: {}]   ;;  %s2038_s3 = inlined_call_operand.hbm [shape: f32[128,128], index: 3, kind: input, shape index: {}]   ;;  %s2039_s4 = inlined_call_operand.hbm [shape: f32[16,128], index: 4, kind: output, shape index: {0}]   ;;  %s2040_s5 = inlined_call_operand.vmem [shape: f32[16,8], index: 5, kind: output, shape index: {1}]  }
   0x1   :  { %2046 = sst [smem:[#allocation16_spill]] %s2035_s0 }
   0x2   :  { %11 = vsyncpa [#allocation3], 0 }
   0x3   :  { %13 = vsyncpa [#allocation3 + $0x1], 0 }
   0x4   :  { %14 = vsyncpa [#allocation6], 0 }
   0x5   :  { %16 = vsyncpa [#allocation6 + $0x1], 0 }
   0x6   :  { %17 = vsyncpa [#allocation9], 0 }
   0x7   :  { %18 = vsyncpa [#allocation4], 0 }
   0x8   :  { %20 = vsyncpa [#allocation4 + $0x1], 0  ;;  %s1604_s18 = smov 0   ;;  %s1606_s19 = smov 0  }
   0x9   :  { %s1608_s20 = smov 0   ;;  %s1610_s21 = smov 0  }
   0xa LB: > { %s1625_s22 = sadd.s32 4294967295, %s1559_s21   ;;  %s1199_s23 = sadd.s32 4294967294, %s1559_s21   ;;  %s1559_s21 = sphi %s1610_s21, %s2069_s21   ;;  %s1555_s20 = sphi %s1608_s20, %s2068_s20   ;;  %s1551_s19 = sphi %s1606_s19, %s2067_s19   ;;  %s1547_s18 = sphi %s1604_s18, %s2066_s18  }
   0xb   : > { %p46_p0 = scmp.ne.s32.totalorder %s1551_s19, %s1547_s18  ;;  %p2041_p1 = scmp.eq.s32.totalorder %s1625_s22, 0 }
   0xc   : > { %p144_p3 = scmp.eq.s32.totalorder %s1199_s23, 1  ;;  %p1200_p5 = scmp.ge.s32.totalorder %s1559_s21, 1 }
   0xd   : > { %p1634_p4 = por %p2041_p1, %p46_p0  ;;  %p177_p7 = scmp.lt.s32.totalorder %s1559_s21, 3 }
   0xe   : > { %p1639_p6 = por %p144_p3, %p46_p0  ;;  %s1561_s27 = smov [#allocation7]  }
   0xf   : > { %s2047_s24 = scalar_select %p1634_p4, 1, 0 }
  0x10   : > { %s2048_s25 = scalar_select %p1639_p6, 1, 0 }
  0x11   : > { %p1644_p8 = pnand %p1200_p5, %p177_p7  ;;  %s189_s28 = sshll.u32 %s1561_s27, 4  ;;  %s190_s28 = int_to_ptr.vmem [resolvable:$true] %s189_s28 }
  0x12   : > { %s1562_s30 = smov [#allocation8]   ;;  %s1386_s7 = scalar_lea.vmem %s190_s28, 4096 }
  0x13   : > { %p1287_p9 = pneg %p1644_p8  ;;  %s202_s6 = sshll.u32 %s1562_s30, 4  ;;  %s203_s6 = int_to_ptr.vmem [resolvable:$true] %s202_s6 }
  0x14   : > { %p1387_p13 = scmp.ne.s32.totalorder %s190_s28, %s1386_s7  ;;  %p1394_p5 = scmp.lt.s32.totalorder %s190_s28, %s190_s28 }
  0x15   : > { %p1653_p11 = pnand %p1287_p9, %p2041_p1  ;;  %p1395_p7 = scmp.lt.s32.totalorder %s1386_s7, %s1386_s7 }
  0x17   : > { %p1377_p12 = pneg %p1653_p11  ;;  %p1396_p10 = por %p1395_p7, %p1394_p5 }
  0x19   : > { %p1389_p0 = pnand %p1387_p13, %p1377_p12 }
  0x1b   : > { %p1390_p3 = pneg %p1389_p0 }
  0x1d   : > { %p1397_p9 = pnand %p1396_p10, %p1390_p3 }
  0x1f   : > { %1400 = shalt.err (!%p1397_p9)
}
  0x20   : > { %s1563_s8 = smov 256   ;;  %s1564_s9 = smov 16  }
  0x21   : > { %1290 = dma.hbm_to_vmem [thread:$0]  (!%p1653_p11), %s2037_s2, 4096, %s190_s28, [#allocation6], %s1563_s8, %s1563_s8, %s1564_s9  }
  0x22   : > { %s1412_s12 = scalar_lea.vmem %s203_s6, 2048  ;;  %p1420_p2 = scmp.lt.s32.totalorder %s203_s6, %s203_s6 }
  0x23   : > { %p1413_p1 = scmp.ne.s32.totalorder %s203_s6, %s1412_s12  ;;  %p1421_p6 = scmp.lt.s32.totalorder %s1412_s12, %s1412_s12 }
  0x25   : > { %p1415_p13 = pnand %p1413_p1, %p1377_p12  ;;  %p1422_p5 = por %p1421_p6, %p1420_p2 }
  0x27   : > { %p1416_p0 = pneg %p1415_p13 }
  0x29   : > { %p1423_p10 = pnand %p1422_p5, %p1416_p0 }
  0x2b   : > { %1426 = shalt.err (!%p1423_p10)
}
  0x2c   : > { %s2042_s13 = smov 128   ;;  %s2043_s14 = smov 8  }
  0x2d   : > { %1293 = dma.hbm_to_vmem [thread:$0]  (!%p1653_p11), %s2038_s3, 2048, %s203_s6, [#allocation9], %s2042_s13, %s2042_s13, %s2043_s14  }
  0x2e   : > { %s1679_s17 = sadd.s32 1, %s1559_s21   ;;  %s33_s27 = sadd.s32 1, %s1555_s20 }
  0x2f   : > { %s30_s23 = ssub.s32 %s1559_s21, %s1679_s17  ;;  %p40_p2 = scmp.ne.s32.totalorder %s1555_s20, %s1551_s19 }
  0x30   : > { %p31_p1 = scmp.eq.s32.totalorder %s30_s23, 0  ;;  %p41_p6 = scmp.eq.s32.totalorder %s1559_s21, 0 }
  0x31   : > { %p2051_p3 = scmp.eq.s32.totalorder %s1625_s22, 1  ;;  %p1307_p9 = scmp.lt.s32.totalorder %s1559_s21, 2 }
  0x32   : > { %s1688_s28 = scalar_select %p31_p1, %s1555_s20, %s33_s27  }
  0x33   : > { %p42_p12 = por %p41_p6, %p40_p2  ;;  %p1692_p7 = por %p2051_p3, %p40_p2 }
  0x34   : > { %s1698_s30 = sand.u32 1, %s1555_s20   ;;  %s1205_s7 = sshll.u32 %s1559_s21, 7 }
  0x35   : > { %s2052_s29 = scalar_select %p1692_p7, 1, 0 }
  0x36   : > { %s1204_s6 = sshll.u32 %s1698_s30, 3  ;;  %s2053_s0 = sld [smem:[#allocation16_spill]] }
  0x37   : > { %s220_s11 = scalar_lea.vmem [#allocation2], %s1204_s6  ;;  %p1709_p11 = pnand %p1307_p9, %p42_p12 }
  0x38   : > { %s227_s12 = sshll.u32 %s220_s11, 4  ;;  %s1206_s16 = sshll.u32 %s1698_s30, 6  ;;  %s1707_s12 = int_to_ptr.vmem [resolvable:$true] %s227_s12 }
  0x39   : > { %s217_s27 = scalar_lea.sflag [#allocation3], %s1698_s30  ;;  %p1429_p0 = pneg %p1709_p11 }
  0x3c   : > { %s1705_s10 = scalar_lea.hbm %s2053_s0, %s1205_s7  ;;  %s1432_s8 = scalar_lea.hbm %s2053_s0, 256 }
  0x3d   : > { %s1427_s13 = scalar_lea.hbm %s1705_s10, 128  ;;  %p1433_p1 = scmp.lt.s32.totalorder %s1705_s10, %s2053_s0 }
  0x3e   : > { %p1428_p13 = scmp.ne.s32.totalorder %s1705_s10, %s1427_s13  ;;  %p1434_p2 = scmp.lt.s32.totalorder %s1432_s8, %s1427_s13 }
  0x40   : > { %p1430_p5 = pnand %p1429_p0, %p1428_p13  ;;  %p1435_p6 = por %p1434_p2, %p1433_p1 }
  0x42   : > { %p1431_p10 = pneg %p1430_p5 }
  0x44   : > { %p1436_p12 = pnand %p1435_p6, %p1431_p10 }
  0x46   : > { %1439 = shalt.err (!%p1436_p12)
}
  0x47   : > { %s1440_s14 = scalar_lea.vmem %s1707_s12, 128  ;;  %s1567_s6 = smov [#allocation2]  }
  0x48   : > { %p1441_p3 = scmp.ne.s32.totalorder %s1707_s12, %s1440_s14  ;;  %s1445_s7 = sshll.u32 %s1567_s6, 4  ;;  %s1446_s7 = int_to_ptr.vmem [resolvable:$false] %s1445_s7 }
  0x49   : > { %s1447_s23 = scalar_lea.vmem %s1446_s7, 256  ;;  %p1448_p5 = scmp.lt.s32.totalorder %s1707_s12, %s1446_s7 }
  0x4a   : > { %p1443_p9 = pnand %p1441_p3, %p1429_p0  ;;  %p1449_p7 = scmp.lt.s32.totalorder %s1447_s23, %s1440_s14 }
  0x4c   : > { %p1444_p13 = pneg %p1443_p9  ;;  %p1450_p4 = por %p1449_p7, %p1448_p5 }
  0x4e   : > { %p1451_p1 = pnand %p1450_p4, %p1444_p13 }
  0x50   : > { %1454 = shalt.err (!%p1451_p1)
}
  0x51   : > { %1297 = dma.hbm_to_vmem [thread:$0]  (!%p1709_p11), %s1705_s10, 128, %s1707_s12, %s217_s27  }
  0x52   : > { %s238_s13 = scalar_lea.vmem [#allocation5], %s1206_s16  ;;  %s1220_s9 = sshll.u32 %s1559_s21, 10 }
  0x53   : > { %s245_s8 = sshll.u32 %s238_s13, 4  ;;  %s1748_s23 = scalar_lea.hbm %s2036_s1, %s1220_s9  ;;  %s1742_s8 = int_to_ptr.vmem [resolvable:$true] %s245_s8 }
  0x54   : > { %s2055_s6 = sand.u32 1, %s1559_s21   ;;  %s1455_s0 = scalar_lea.hbm %s1748_s23, 1024 }
  0x55   : > { %s235_s7 = scalar_lea.sflag [#allocation6], %s2055_s6  ;;  %p1456_p4 = scmp.ne.s32.totalorder %s1748_s23, %s1455_s0 }
  0x56   : > { %s1460_s12 = scalar_lea.hbm %s2036_s1, 2048  ;;  %p1461_p2 = scmp.lt.s32.totalorder %s1748_s23, %s2036_s1 }
  0x57   : > { %p1458_p7 = pnand %p1456_p4, %p1429_p0  ;;  %p1462_p6 = scmp.lt.s32.totalorder %s1460_s12, %s1455_s0 }
  0x59   : > { %p1459_p10 = pneg %p1458_p7  ;;  %p1463_p12 = por %p1462_p6, %p1461_p2 }
  0x5b   : > { %p1464_p3 = pnand %p1463_p12, %p1459_p10 }
  0x5d   : > { %1467 = shalt.err (!%p1464_p3)
}
  0x5e   : > { %s1468_s13 = scalar_lea.vmem %s1742_s8, 1024  ;;  %s1568_s9 = smov [#allocation5]  }
  0x5f   : > { %p1469_p9 = scmp.ne.s32.totalorder %s1742_s8, %s1468_s13  ;;  %s1473_s11 = sshll.u32 %s1568_s9, 4  ;;  %s1474_s11 = int_to_ptr.vmem [resolvable:$false] %s1473_s11 }
  0x60   : > { %s1475_s14 = scalar_lea.vmem %s1474_s11, 2048  ;;  %p1476_p1 = scmp.lt.s32.totalorder %s1742_s8, %s1474_s11 }
  0x61   : > { %p1471_p13 = pnand %p1469_p9, %p1429_p0  ;;  %p1477_p4 = scmp.lt.s32.totalorder %s1475_s14, %s1468_s13 }
  0x63   : > { %p1472_p5 = pneg %p1471_p13  ;;  %p1478_p7 = por %p1477_p4, %p1476_p1 }
  0x65   : > { %p1479_p2 = pnand %p1478_p7, %p1472_p5 }
  0x67   : > { %1482 = shalt.err (!%p1479_p2)
}
  0x68   : > { %s2056_s0 = smov 8   ;;  %s2057_s6 = smov 128  }
  0x69   : > { %1300 = dma.hbm_to_vmem [thread:$0]  (!%p1709_p11), %s1748_s23, 1024, %s1742_s8, %s235_s7, %s2057_s6, %s2057_s6, %s2056_s0  }
  0x6a   : > { %257 = sbr.rel (%p1644_p8) target bundleno = 1373 (0x55d), region = 36  ;;  %s1780_s30 = sand.u32 (!%p1644_p8), 1, %s1551_s19  }
  0x6b   : > { %s1210_s10 = sshll.u32 (!%p1644_p8), %s1780_s30, 3  ;;  %s260_s12 = scalar_lea.sflag (!%p1644_p8), [#allocation3], %s1780_s30 }
  0x6c   : > { %s1786_s15 = scalar_lea.vmem (!%p1644_p8), [#allocation2], %s1210_s10  ;;  %p2058_p0 = scmp.ne.s32.totalorder (!%p1644_p8), %s2047_s24, 0 }
  0x6f   : > { %1526 = dma.done.wait (%p2058_p0), %s260_s12, 128  }
  0x70   : > { %1528 = vsyncadd (%p2058_p0), %s260_s12, 4294967168  ;;  %s268_s26 = sand.u32 1, %s1625_s22   ;;  %s1211_s8 = sshll.u32 %s1780_s30, 6 }
  0x71   : > { %s269_s23 = scalar_lea.sflag [#allocation6], %s268_s26  ;;  %s1794_s7 = scalar_lea.vmem [#allocation5], %s1211_s8 }
  0x72   : > { %1530 = dma.done.wait (%p2058_p0), %s269_s23, 1024  }
  0x73   : > { %1532 = vsyncadd (%p2058_p0), %s269_s23, 4294966272  ;;  %p2059_p8 = scmp.eq.s32.totalorder %s1625_s22, 0 }
  0x75   : > { %1534 = dma.done.wait (%p2059_p8), [#allocation6], 4096   ;;  %p2060_p11 = pmov %p2059_p8 }
  0x76   : > { %p2061_p10 = pmov %p2059_p8 }
  0x77   : > { %1536 = vsyncadd (%p2060_p11), [#allocation6], 4294963200 }
  0x78   : > { %1538 = dma.done.wait (%p2061_p10), [#allocation9], 2048   ;;  %p2062_p6 = pmov %p2059_p8 }
  0x79   : > { %v1569_v0 = vmov 0.0   ;;  %v361_v1 = vld [vmem:[#allocation7 + $0xf8] sm:$0xff]  ;;  %v360_v2 = vld [vmem:[#allocation7 + $0xf0] sm:$0xff]  ;;  %v359_v3 = vld [vmem:[#allocation7 + $0xe8] sm:$0xff]  ;;  %v1570_v34 = vmov 1966171168   ;;  %v438_v36 = vlaneseq }
  0x7a   : > { %1540 = vsyncadd (%p2062_p6), [#allocation9], 4294965248  ;;  %426 = vmatprep.mubr.f32.mxu0 %v1569_v0  ;;  %1238 = vmatprep.subr.mxu1 %v1569_v0  ;;  %v358_v4 = vld [vmem:[#allocation7 + $0xe0] sm:$0xff]  ;;  %v357_v5 = vld [vmem:[#allocation7 + $0xd8] sm:$0xff]  ;;  %v436_v35 = vunpack.c.l.s4 %v1570_v34  ;;  %vm589_vm0 = vcmask 1041409   ;;  %vm591_vm1 = vcmask 1042434  }
  0x7b   : > { %362 = vmatprep.subr.mxu0 %v361_v1  ;;  %v356_v6 = vld [vmem:[#allocation7 + $0xd0] sm:$0xff]  ;;  %v355_v7 = vld [vmem:[#allocation7 + $0xc8] sm:$0xff]  ;;  %v354_v8 = vld [vmem:[#allocation7 + $0xc0] sm:$0xff]  ;;  %v1811_v38 = vshrl.u32 %v438_v36, 7  ;;  %vm593_vm2 = vcmask 1043459   ;;  %vm595_vm3 = vcmask 1044484  }
  0x7c   : > { %363 = vmatpush1.msra.mxu0 %v360_v2  ;;  %v353_v9 = vld [vmem:[#allocation7 + $0xb8] sm:$0xff]  ;;  %v352_v10 = vld [vmem:[#allocation7 + $0xb0] sm:$0xff]  ;;  %v351_v11 = vld [vmem:[#allocation7 + $0xa8] sm:$0xff]  ;;  %v437_v37 = vunpack.c.0.s8 %v436_v35  ;;  %vm597_vm4 = vcmask 1045509   ;;  %vm599_vm5 = vcmask 1046534   ;;  %vm601_vm6 = vcmask 1047559  }
  0x7d   : > { %364 = vmatprep.subr.mxu0 %v359_v3  ;;  %v350_v12 = vld [vmem:[#allocation7 + $0xa0] sm:$0xff]  ;;  %v349_v13 = vld [vmem:[#allocation7 + $0x98] sm:$0xff]  ;;  %v348_v14 = vld [vmem:[#allocation7 + $0x90] sm:$0xff]  ;;  %v1815_v43 = vsub.s32 0, %v1811_v38  ;;  %vm604_vm7 = vcmask 64512   ;;  %vm1572_vm8 = vmmov 0  }
  0x7e   : > { %365 = vmatpush1.msra.mxu0 %v358_v4  ;;  %v347_v15 = vld [vmem:[#allocation7 + $0x88] sm:$0xff]  ;;  %v346_v16 = vld [vmem:[#allocation7 + $0x80] sm:$0xff]  ;;  %v345_v17 = vld [vmem:[#allocation7 + $0x78] sm:$0xff]  ;;  %v440_v39 = vsub.s32 %v437_v37, %v1811_v38  ;;  %1270 = vmatprep.mubr.msk.f32.mxu1 %vm1572_vm8, %v1569_v0  ;;  %p317_p12 = scmp.lt.s32.totalorder %s1625_s22, 1  ;;  %s1217_s11 = sshll.u32 %s1625_s22, 7 }
  0x7f   : > { %366 = vmatprep.subr.mxu0 %v357_v5  ;;  %v344_v18 = vld [vmem:[#allocation7 + $0x70] sm:$0xff]  ;;  %v343_v19 = vld [vmem:[#allocation7 + $0x68] sm:$0xff]  ;;  %v342_v20 = vld [vmem:[#allocation7 + $0x60] sm:$0xff]  ;;  %s309_s14 = scalar_lea.vmem [#allocation10], %s1210_s10  ;;  %s1043_s26 = scalar_lea.sflag [#allocation4], %s1780_s30 }
  0x80   : > { %367 = vmatpush1.msra.mxu0 %v356_v6  ;;  %v341_v21 = vld [vmem:[#allocation7 + $0x58] sm:$0xff]  ;;  %v340_v22 = vld [vmem:[#allocation7 + $0x50] sm:$0xff]  ;;  %v339_v23 = vld [vmem:[#allocation7 + $0x48] sm:$0xff]  ;;  %s1964_s24 = scalar_select %p317_p12, %s1625_s22, 1 }
  0x81   : > { %368 = vmatprep.subr.mxu0 %v355_v7  ;;  %v338_v24 = vld [vmem:[#allocation7 + $0x40] sm:$0xff]  ;;  %v337_v25 = vld [vmem:[#allocation7 + $0x38] sm:$0xff]  ;;  %v336_v26 = vld [vmem:[#allocation7 + $0x30] sm:$0xff]  ;;  %s1060_s0 = sshll.u32 %s309_s14, 4  ;;  %p2063_p9 = scmp.ne.s32.totalorder %s2052_s29, 0  ;;  %s1061_s0 = int_to_ptr.vmem [resolvable:$true] %s1060_s0 }
  0x82   : > { %369 = vmatpush1.msra.mxu0 %v354_v8  ;;  %v335_v27 = vld [vmem:[#allocation7 + $0x28] sm:$0xff]  ;;  %v334_v28 = vld [vmem:[#allocation7 + $0x20] sm:$0xff]  ;;  %v333_v29 = vld [vmem:[#allocation7 + $0x18] sm:$0xff]  ;;  %s1215_s16 = sshll.u32 %s1964_s24, 3  ;;  %s1483_s8 = scalar_lea.vmem %s1061_s0, 128 }
  0x83   : > { %370 = vmatprep.subr.mxu0 %v353_v9  ;;  %v332_v30 = vld [vmem:[#allocation7 + $0x10] sm:$0xff]  ;;  %v331_v31 = vld [vmem:[#allocation7 + $0x8] sm:$0xff]  ;;  %v330_v32 = vld [vmem:[#allocation7] sm:$0xff]  ;;  %s320_s9 = scalar_lea.vmem %s2040_s5, %s1215_s16  ;;  %p1484_p3 = scmp.ne.s32.totalorder %s1061_s0, %s1483_s8 }
  0x84   : > { %371 = vmatpush1.msra.mxu0 %v352_v10  ;;  %v321_v33 = vld [vmem:[%s1786_s15] sm:$0xff]  ;;  %v1818_v47 = vld [vmem:[%s1794_s7] sm:$0xff]  ;;  %v1828_v58 = vld [vmem:[%s1794_s7 + $0x8] sm:$0xff]  ;;  %s1998_s15 = scalar_lea.hbm %s2039_s4, %s1217_s11  ;;  %s1573_s23 = smov [#allocation10]  }
  0x85   : > { %372 = vmatprep.subr.mxu0 %v351_v11  ;;  %v1822_v52 = vld [vmem:[%s1794_s7 + $0x10] sm:$0xff]  ;;  %v1833_v62 = vld [vmem:[%s1794_s7 + $0x18] sm:$0xff]  ;;  %v1838_v3 = vld [vmem:[%s1794_s7 + $0x20] sm:$0xff]  ;;  %p1485_p13 = pnand %p1484_p3, %p2063_p9 }
  0x86   : > { %373 = vmatpush1.msra.mxu0 %v350_v12  ;;  %v1843_v7 = vld [vmem:[%s1794_s7 + $0x28] sm:$0xff]  ;;  %v1848_v10 = vld [vmem:[%s1794_s7 + $0x30] sm:$0xff] }
  0x87   : > { %374 = vmatprep.subr.mxu0 %v349_v13  ;;  %v1853_v13 = vld [vmem:[%s1794_s7 + $0x38] sm:$0xff]  ;;  %p1486_p5 = pneg %p1485_p13  ;;  %s1487_s7 = sshll.u32 %s1573_s23, 4  ;;  %s1488_s7 = int_to_ptr.vmem [resolvable:$false] %s1487_s7 }
  0x88   : > { %375 = vmatpush1.msra.mxu0 %v348_v14  ;;  %s1489_s22 = scalar_lea.vmem %s1488_s7, 256  ;;  %p1490_p1 = scmp.lt.s32.totalorder %s1061_s0, %s1488_s7 }
  0x89   : > { %376 = vmatprep.subr.mxu0 %v347_v15  ;;  %p1491_p4 = scmp.lt.s32.totalorder %s1489_s22, %s1483_s8 }
  0x8a   : > { %377 = vmatpush1.msra.mxu0 %v346_v16  ;;  %v556_v16 = vand.u32 127, %v438_v36 }
  0x8b   : > { %378 = vmatprep.subr.mxu0 %v345_v17  ;;  %p1492_p7 = por %p1491_p4, %p1490_p1 }
  0x8c   : > { %379 = vmatpush1.msra.mxu0 %v344_v18  ;;  %v1858_v18 = vsub.s32 %v556_v16, %v1811_v38 }
  0x8d   : > { %380 = vmatprep.subr.mxu0 %v343_v19  ;;  %p1493_p2 = pnand %p1492_p7, %p1486_p5 }
  0x8e   : > { %381 = vmatpush1.msra.mxu0 %v342_v20 }
  0x8f   : > { %382 = vmatprep.subr.mxu0 %v341_v21 }
  0x90   : > { %383 = vmatpush1.msra.mxu0 %v340_v22 }
  0x91   : > { %384 = vmatprep.subr.mxu0 %v339_v23 }
  0x92   : > { %385 = vmatpush1.msra.mxu0 %v338_v24 }
  0x93   : > { %386 = vmatprep.subr.mxu0 %v337_v25 }
  0x94   : > { %387 = vmatpush1.msra.mxu0 %v336_v26 }
  0x95   : > { %388 = vmatprep.subr.mxu0 %v335_v27 }
  0x96   : > { %389 = vmatpush1.msra.mxu0 %v334_v28 }
  0x97   : > { %390 = vmatprep.subr.mxu0 %v333_v29 }
  0x98   : > { %391 = vmatpush1.msra.mxu0 %v332_v30 }
  0x99   : > { %392 = vmatprep.subr.mxu0 %v331_v31 }
  0x9a   : > { %393 = vmatpush1.msra.mxu0 %v330_v32 }
  0x9b   : > { %427 = vmatmul.mubr.f32.vlgmr.msra.gmra.mxu0 %v321_v33 }
 0x15b   : > { %v428_v40 = vpop.f32.mrf.mxu0 }
 0x15c   : > { %v434_v41 = vcombine.high %v428_v40, %v428_v40  ;;  %v441_v42 = vrot.slane %v428_v40, %v440_v39 }
 0x15e   : > { %v448_v44 = vrot.slane %v434_v41, %v440_v39  ;;  %v449_v45 = vcombine.high %v441_v42, %v441_v42  ;;  %v457_v46 = vrot.slane %v441_v42, %v440_v39 }
 0x160   : > { %v450_v48 = vcombine.high %v448_v44, %v448_v44  ;;  %v486_v49 = vrot.slane %v457_v46, %v1815_v43  ;;  %v479_v50 = vcombine.high %v457_v46, %v457_v46  ;;  %v471_v51 = vrot.slane %v449_v45, %v440_v39 }
 0x161   : > { %v464_v53 = vrot.slane %v448_v44, %v440_v39  ;;  %v1571_v44 = vmov 0   ;;  %v615_v45 = vsub.s32 1, %v1811_v38  ;;  %v619_v46 = vsub.s32 2, %v1811_v38 }
 0x162   : > { %v523_v54 = vmul.f32 %v486_v49, %v1818_v47  ;;  %v494_v55 = vrot.slane %v479_v50, %v1815_v43  ;;  %v490_v56 = vrot.slane %v471_v51, %v1815_v43  ;;  %v481_v57 = vcombine.high %v471_v51, %v471_v51  ;;  %1354 = vset.pattern.permute.xlu0 %v1571_v44 }
 0x163   : > { %v478_v61 = vrot.slane %v450_v48, %v440_v39  ;;  %v502_v1 = vrot.slane %v464_v53, %v1815_v43  ;;  %v480_v2 = vcombine.high %v464_v53, %v464_v53  ;;  %1353 = vset.pattern.permute.xlu1 %v1571_v44  ;;  %v623_v48 = vsub.s32 3, %v1811_v38 }
 0x164   : > { %531 = vadd.xlane.f32.xlu0 %v523_v54  ;;  %v525_v59 = vmul.f32 %v494_v55, %v1822_v52  ;;  %v498_v60 = vrot.slane %v481_v57, %v1815_v43  ;;  %v524_v63 = vmul.f32 %v490_v56, %v1828_v58  ;;  %v627_v54 = vsub.s32 4, %v1811_v38 }
 0x165   : > { %v506_v5 = vrot.slane %v478_v61, %v1815_v43  ;;  %v482_v6 = vcombine.high %v478_v61, %v478_v61  ;;  %v527_v8 = vmul.f32 %v502_v1, %v1838_v3  ;;  %v510_v9 = vrot.slane %v480_v2, %v1815_v43 }
 0x166   : > { %535 = vadd.xlane.f32.xlu1 %v525_v59  ;;  %v526_v4 = vmul.f32 %v498_v60, %v1833_v62 }
 0x167   : > { %v528_v11 = vmul.f32 %v506_v5, %v1843_v7  ;;  %v514_v12 = vrot.slane %v482_v6, %v1815_v43  ;;  %v529_v14 = vmul.f32 %v510_v9, %v1848_v10  ;;  %v635_v5 = vsub.s32 6, %v1811_v38 }
 0x168   : > { %533 = vadd.xlane.f32.xlu0 %v524_v63  ;;  %v631_v63 = vsub.s32 5, %v1811_v38 }
 0x169   : > { %v530_v15 = vmul.f32 %v514_v12, %v1853_v13 }
 0x16a   : > { %537 = vadd.xlane.f32.xlu1 %v526_v4 }
 0x16c   : > { %539 = vadd.xlane.f32.xlu0 %v527_v8 }
 0x16e   : > { %541 = vadd.xlane.f32.xlu1 %v528_v11  ;;  %v639_v11 = vsub.s32 7, %v1811_v38  ;;  %v946_v38 = vld [vmem:[#allocation8 + $0x40] sm:$0xff] }
 0x170   : > { %543 = vadd.xlane.f32.xlu0 %v529_v14 }
 0x172   : > { %545 = vadd.xlane.f32.xlu1 %v530_v15 }
 0x1ed   : > { %v532_v17 = vpop.xlane.xlu0 %531 }
 0x1ee   : > { %v560_v21 = vrot.slane %v532_v17, %v1858_v18 }
 0x1ef   : > { %v536_v19 = vpop.xlane.xlu1 %535 }
 0x1f0   : > { %v568_v23 = vrot.slane %v536_v19, %v1858_v18 }
 0x1f1   : > { %v534_v20 = vpop.xlane.xlu0 %533 }
 0x1f2   : > { %v564_v22 = vrot.slane %v534_v20, %v1858_v18 }
 0x1f3   : > { %v538_v24 = vpop.xlane.xlu1 %537 }
 0x1f4   : > { %v590_v25 = vsel %vm589_vm0, %v564_v22, %v560_v21  ;;  %v572_v26 = vrot.slane %v538_v24, %v1858_v18 }
 0x1f5   : > { %v592_v27 = vsel %vm591_vm1, %v568_v23, %v590_v25  ;;  %v540_v28 = vpop.xlane.xlu0 %539 }
 0x1f6   : > { %v594_v29 = vsel %vm593_vm2, %v572_v26, %v592_v27  ;;  %v576_v30 = vrot.slane %v540_v28, %v1858_v18 }
 0x1f7   : > { %v542_v31 = vpop.xlane.xlu1 %541 }
 0x1f8   : > { %v596_v32 = vsel %vm595_vm3, %v576_v30, %v594_v29  ;;  %v580_v33 = vrot.slane %v542_v31, %v1858_v18 }
 0x1f9   : > { %v544_v34 = vpop.xlane.xlu0 %543 }
 0x1fa   : > { %v584_v35 = vrot.slane %v544_v34, %v1858_v18  ;;  %v598_v36 = vsel %vm597_vm4, %v580_v33, %v596_v32 }
 0x1fb   : > { %v546_v37 = vpop.xlane.xlu1 %545 }
 0x1fc   : > { %v588_v39 = vrot.slane %v546_v37, %v1858_v18  ;;  %v600_v40 = vsel %vm599_vm5, %v584_v35, %v598_v36 }
 0x1fe   : > { %v602_v41 = vsel %vm601_vm6, %v588_v39, %v600_v40 }
 0x1ff   : > { %v605_v42 = vsel %vm604_vm7, %v602_v41, -inf }
 0x200   : > { %606 = vmax.xlane.f32.xlu0 %v605_v42 }
 0x289   : > { %v607_v49 = vpop.xlane.xlu0 %606 }
 0x28a   : > { %v612_v50 = vrot.slane %v607_v49, %v1815_v43  ;;  %v616_v51 = vrot.slane %v607_v49, %v615_v45  ;;  %v620_v53 = vrot.slane %v607_v49, %v619_v46  ;;  %v624_v55 = vrot.slane %v607_v49, %v623_v48 }
 0x28b   : > { %v628_v1 = vrot.slane %v607_v49, %v627_v54  ;;  %v632_v6 = vrot.slane %v607_v49, %v631_v63  ;;  %v636_v12 = vrot.slane %v607_v49, %v635_v5  ;;  %v640_v16 = vrot.slane %v607_v49, %v639_v11 }
 0x28c   : > { %v649_v56 = vsub.f32 %v532_v17, %v612_v50  ;;  %v650_v57 = vsub.f32 %v534_v20, %v616_v51  ;;  %v651_v59 = vsub.f32 %v536_v19, %v620_v53  ;;  %v652_v2 = vsub.f32 %v538_v24, %v624_v55 }
 0x28d   : > { %v653_v8 = vsub.f32 %v540_v28, %v628_v1  ;;  %v654_v14 = vsub.f32 %v542_v31, %v632_v6  ;;  %v655_v17 = vsub.f32 %v544_v34, %v636_v12  ;;  %v656_v22 = vsub.f32 %v546_v37, %v640_v16 }
 0x28e   : > { %v657_v60 = vmul.f32 1.442695, %v649_v56  ;;  %v659_v61 = vmul.f32 1.442695, %v650_v57  ;;  %v661_v4 = vmul.f32 1.442695, %v651_v59 }
 0x28f   : > { %v663_v9 = vmul.f32 1.442695, %v652_v2  ;;  %v665_v15 = vmul.f32 1.442695, %v653_v8  ;;  %v667_v19 = vmul.f32 1.442695, %v654_v14 }
 0x290   : > { %1355 = vpow2.f32 %v657_v60  ;;  %v669_v23 = vmul.f32 1.442695, %v655_v17  ;;  %v671_v25 = vmul.f32 1.442695, %v656_v22 }
 0x291   : > { %1357 = vpow2.f32 %v659_v61 }
 0x292   : > { %1359 = vpow2.f32 %v661_v4 }
 0x293   : > { %1361 = vpow2.f32 %v663_v9 }
 0x294   : > { %1363 = vpow2.f32 %v665_v15 }
 0x295   : > { %1365 = vpow2.f32 %v667_v19 }
 0x296   : > { %1367 = vpow2.f32 %v669_v23 }
 0x297   : > { %1369 = vpow2.f32 %v671_v25 }
 0x29d   : > { %v1356_v20 = vpop.eup %1355 }
 0x29e   : > { %v1358_v21 = vpop.eup %1357  ;;  %682 = vperm.xlu1 %1353, %v1356_v20  }
 0x29f   : > { %685 = vperm.xlu0 %1354, %v1358_v21   ;;  %v1360_v24 = vpop.eup %1359 }
 0x2a0   : > { %v1362_v26 = vpop.eup %1361 }
 0x2a1   : > { %v1364_v27 = vpop.eup %1363 }
 0x2a2   : > { %688 = vperm.xlu1 %1353, %v1360_v24   ;;  %v1366_v28 = vpop.eup %1365 }
 0x2a3   : > { %v1898_v29 = vpop.eup %1367 }
 0x2a4   : > { %v1901_v30 = vpop.eup %1369 }
 0x2a6   : > { %691 = vperm.xlu1 %1353, %v1362_v26  }
 0x2aa   : > { %694 = vperm.xlu1 %1353, %v1364_v27  }
 0x2ae   : > { %697 = vperm.xlu1 %1353, %v1366_v28  }
 0x2b2   : > { %700 = vperm.xlu1 %1353, %v1898_v29  }
 0x2b6   : > { %703 = vperm.xlu1 %1353, %v1901_v30  }
 0x319   : > { %v683_v31 = vpop.permute.xlu1 %682 }
 0x31a   : > { %v686_v35 = vpop.permute.xlu0 %685  ;;  %v708_v39 = vrot.slane %v683_v31, %v1858_v18 }
 0x31b   : > { %v712_v37 = vrot.slane %v686_v35, %v1858_v18  ;;  %v940_v35 = vld [vmem:[#allocation8 + $0x10] sm:$0xff] }
 0x31d   : > { %v689_v32 = vpop.permute.xlu1 %688  ;;  %v737_v49 = vsel %vm589_vm0, %v712_v37, %v708_v39  ;;  %v938_v37 = vld [vmem:[#allocation8] sm:$0xff] }
 0x31e   : > { %v716_v40 = vrot.slane %v689_v32, %v1858_v18  ;;  %v947_v32 = vld [vmem:[#allocation8 + $0x48] sm:$0xff] }
 0x320   : > { %v738_v51 = vsel %vm591_vm1, %v716_v40, %v737_v49 }
 0x321   : > { %v692_v33 = vpop.permute.xlu1 %691 }
 0x322   : > { %v720_v41 = vrot.slane %v692_v33, %v1858_v18  ;;  %v942_v33 = vld [vmem:[#allocation8 + $0x20] sm:$0xff] }
 0x324   : > { %v739_v55 = vsel %vm593_vm2, %v720_v41, %v738_v51 }
 0x325   : > { %v695_v34 = vpop.permute.xlu1 %694 }
 0x326   : > { %v724_v42 = vrot.slane %v695_v34, %v1858_v18  ;;  %v941_v34 = vld [vmem:[#allocation8 + $0x18] sm:$0xff] }
 0x328   : > { %v740_v56 = vsel %vm595_vm3, %v724_v42, %v739_v55 }
 0x329   : > { %v698_v36 = vpop.permute.xlu1 %697 }
 0x32a   : > { %v728_v50 = vrot.slane %v698_v36, %v1858_v18  ;;  %v939_v36 = vld [vmem:[#allocation8 + $0x8] sm:$0xff] }
 0x32c   : > { %v741_v59 = vsel %vm597_vm4, %v728_v50, %v740_v56 }
 0x32d   : > { %v701_v44 = vpop.permute.xlu1 %700 }
 0x32e   : > { %v732_v53 = vrot.slane %v701_v44, %v1858_v18 }
 0x330   : > { %v742_v61 = vsel %vm599_vm5, %v732_v53, %v741_v59 }
 0x331   : > { %v704_v57 = vpop.permute.xlu1 %703 }
 0x332   : > { %v736_v60 = vrot.slane %v704_v57, %v1858_v18 }
 0x334   : > { %v743_v1 = vsel %vm601_vm6, %v736_v60, %v742_v61 }
 0x335   : > { %v745_v2 = vsel %vm604_vm7, %v743_v1, 0.0 }
 0x336   : > { %746 = vadd.xlane.f32.xlu1 %v745_v2 }
 0x3bf   : > { %v747_v4 = vpop.xlane.xlu1 %746 }
 0x3c0   : > { %1371 = vrcp.f32 %v747_v4 }
 0x3cd   : > { %v1372_v6 = vpop.eup %1371 }
 0x3ce   : > { %v749_v8 = vmul.f32 %v1372_v6, %v747_v4 }
 0x3d0   : > { %v750_v9 = vsub.f32 2.0, %v749_v8 }
 0x3d2   : > { %v751_v12 = vmul.f32 %v1372_v6, %v750_v9 }
 0x3d4   : > { %v756_v14 = vrot.slane %v751_v12, %v1815_v43  ;;  %v760_v16 = vrot.slane %v751_v12, %v615_v45  ;;  %v764_v19 = vrot.slane %v751_v12, %v619_v46  ;;  %v768_v23 = vrot.slane %v751_v12, %v623_v48  ;;  %v952_v46 = vld [vmem:[#allocation8 + $0x70] sm:$0xff] }
 0x3d5   : > { %v772_v31 = vrot.slane %v751_v12, %v627_v54  ;;  %v776_v45 = vrot.slane %v751_v12, %v631_v63  ;;  %v780_v48 = vrot.slane %v751_v12, %v635_v5  ;;  %v950_v54 = vld [vmem:[#allocation8 + $0x60] sm:$0xff]  ;;  %v948_v5 = vld [vmem:[#allocation8 + $0x50] sm:$0xff] }
 0x3d6   : > { %v793_v15 = vmul.f32 %v1356_v20, %v756_v14  ;;  %v794_v17 = vmul.f32 %v1358_v21, %v760_v16  ;;  %v795_v22 = vmul.f32 %v1360_v24, %v764_v19  ;;  %v796_v25 = vmul.f32 %v1362_v26, %v768_v23  ;;  %v953_v20 = vld [vmem:[#allocation8 + $0x78] sm:$0xff]  ;;  %v951_v24 = vld [vmem:[#allocation8 + $0x68] sm:$0xff] }
 0x3d7   : > { %v797_v43 = vmul.f32 %v1364_v27, %v772_v31  ;;  %1239 = vmatpush3.msra.mxu1 %v953_v20  ;;  %v798_v21 = vmul.f32 %v1366_v28, %v776_v45  ;;  %v799_v63 = vmul.f32 %v1898_v29, %v780_v48  ;;  %v784_v26 = vrot.slane %v751_v12, %v639_v11  ;;  %v949_v27 = vld [vmem:[#allocation8 + $0x58] sm:$0xff]  ;;  %v944_v29 = vld [vmem:[#allocation8 + $0x30] sm:$0xff] }
 0x3d8   : > { %810 = vperm.xlu0 %1354, %v793_v15   ;;  %1240 = vmatprep.subr.mxu1 %v1569_v0  ;;  %v945_v11 = vld [vmem:[#allocation8 + $0x38] sm:$0xff] }
 0x3d9   : > { %1241 = vmatpush3.msra.mxu1 %v952_v46  ;;  %v800_v28 = vmul.f32 %v1901_v30, %v784_v26  ;;  %v943_v30 = vld [vmem:[#allocation8 + $0x28] sm:$0xff] }
 0x3da   : > { %1242 = vmatprep.subr.mxu1 %v1569_v0 }
 0x3db   : > { %1243 = vmatpush3.msra.mxu1 %v951_v24 }
 0x3dc   : > { %813 = vperm.xlu0 %1354, %v794_v17   ;;  %1244 = vmatprep.subr.mxu1 %v1569_v0 }
 0x3dd   : > { %1245 = vmatpush3.msra.mxu1 %v950_v54 }
 0x3de   : > { %1246 = vmatprep.subr.mxu1 %v1569_v0 }
 0x3df   : > { %1247 = vmatpush3.msra.mxu1 %v949_v27 }
 0x3e0   : > { %816 = vperm.xlu0 %1354, %v795_v22   ;;  %1248 = vmatprep.subr.mxu1 %v1569_v0 }
 0x3e1   : > { %1249 = vmatpush3.msra.mxu1 %v948_v5 }
 0x3e2   : > { %1250 = vmatprep.subr.mxu1 %v1569_v0 }
 0x3e3   : > { %1251 = vmatpush3.msra.mxu1 %v947_v32 }
 0x3e4   : > { %819 = vperm.xlu0 %1354, %v796_v25   ;;  %1252 = vmatprep.subr.mxu1 %v1569_v0 }
 0x3e5   : > { %1253 = vmatpush3.msra.mxu1 %v946_v38 }
 0x3e6   : > { %1254 = vmatprep.subr.mxu1 %v1569_v0 }
 0x3e7   : > { %1255 = vmatpush3.msra.mxu1 %v945_v11 }
 0x3e8   : > { %822 = vperm.xlu0 %1354, %v797_v43   ;;  %1256 = vmatprep.subr.mxu1 %v1569_v0 }
 0x3e9   : > { %1257 = vmatpush3.msra.mxu1 %v944_v29 }
 0x3ea   : > { %1258 = vmatprep.subr.mxu1 %v1569_v0 }
 0x3eb   : > { %1259 = vmatpush3.msra.mxu1 %v943_v30 }
 0x3ec   : > { %825 = vperm.xlu0 %1354, %v798_v21   ;;  %1260 = vmatprep.subr.mxu1 %v1569_v0 }
 0x3ed   : > { %1261 = vmatpush3.msra.mxu1 %v942_v33 }
 0x3ee   : > { %1262 = vmatprep.subr.mxu1 %v1569_v0 }
 0x3ef   : > { %1263 = vmatpush3.msra.mxu1 %v941_v34 }
 0x3f0   : > { %828 = vperm.xlu0 %1354, %v799_v63   ;;  %1264 = vmatprep.subr.mxu1 %v1569_v0 }
 0x3f1   : > { %1265 = vmatpush3.msra.mxu1 %v940_v35 }
 0x3f2   : > { %1266 = vmatprep.subr.mxu1 %v1569_v0 }
 0x3f3   : > { %1267 = vmatpush3.msra.mxu1 %v939_v36 }
 0x3f4   : > { %831 = vperm.xlu0 %1354, %v800_v28   ;;  %1268 = vmatprep.subr.mxu1 %v1569_v0 }
 0x3f5   : > { %1269 = vmatpush3.msra.mxu1 %v938_v37 }
 0x453   : > { %v811_v39 = vpop.permute.xlu0 %810 }
 0x454   : > { %v882_v49 = vmul.f32 %v811_v39, %v1818_v47 }
 0x456   : > { %v890_v56 = vrot.slane %v882_v49, 4 }
 0x457   : > { %v814_v40 = vpop.permute.xlu0 %813 }
 0x458   : > { %v883_v42 = vmul.f32 %v814_v40, %v1828_v58  ;;  %v891_v58 = vadd.f32 %v890_v56, %v882_v49 }
 0x45a   : > { %v896_v51 = vrot.slane %v883_v42, 4  ;;  %v892_v15 = vrot.slane %v891_v58, 2 }
 0x45b   : > { %v817_v41 = vpop.permute.xlu0 %816 }
 0x45c   : > { %v884_v44 = vmul.f32 %v817_v41, %v1822_v52  ;;  %v897_v60 = vadd.f32 %v896_v51, %v883_v42  ;;  %v840_v52 = vrot.slane %v814_v40, %v1858_v18  ;;  %v844_v9 = vrot.slane %v817_v41, %v1858_v18 }
 0x45d   : > { %v893_v54 = vadd.f32 %v892_v15, %v891_v58 }
 0x45e   : > { %v902_v55 = vrot.slane %v884_v44, 4  ;;  %v898_v8 = vrot.slane %v897_v60, 2 }
 0x45f   : > { %v820_v50 = vpop.permute.xlu0 %819  ;;  %v894_v36 = vrot.slane %v893_v54, 1 }
 0x460   : > { %v885_v53 = vmul.f32 %v820_v50, %v1833_v62  ;;  %v903_v61 = vadd.f32 %v902_v55, %v884_v44  ;;  %v836_v62 = vrot.slane %v811_v39, %v1858_v18  ;;  %v848_v12 = vrot.slane %v820_v50, %v1858_v18 }
 0x461   : > { %v899_v43 = vadd.f32 %v898_v8, %v897_v60  ;;  %v895_v51 = vadd.f32 %v894_v36, %v893_v54 }
 0x462   : > { %v908_v57 = vrot.slane %v885_v53, 4  ;;  %v865_v16 = vsel %vm589_vm0, %v840_v52, %v836_v62 }
 0x463   : > { %v823_v0 = vpop.permute.xlu0 %822  ;;  %v866_v45 = vsel %vm591_vm1, %v844_v9, %v865_v16  ;;  %v900_v38 = vrot.slane %v899_v43, 1 }
 0x464   : > { %v886_v59 = vmul.f32 %v823_v0, %v1838_v3  ;;  %v909_v2 = vadd.f32 %v908_v57, %v885_v53  ;;  %v904_v3 = vrot.slane %v903_v61, 2  ;;  %v852_v19 = vrot.slane %v823_v0, %v1858_v18 }
 0x465   : > { %v867_v21 = vsel %vm593_vm2, %v848_v12, %v866_v45  ;;  %v901_v42 = vadd.f32 %v900_v38, %v899_v43 }
 0x466   : > { %v914_v1 = vrot.slane %v886_v59, 4  ;;  %v910_v17 = vrot.slane %v909_v2, 2  ;;  %v905_v46 = vadd.f32 %v904_v3, %v903_v61  ;;  %v868_v26 = vsel %vm595_vm3, %v852_v19, %v867_v21 }
 0x467   : > { %v826_v47 = vpop.permute.xlu0 %825  ;;  %v962_v56 = vsel %vm589_vm0, %v901_v42, %v895_v51 }
 0x468   : > { %v915_v4 = vadd.f32 %v914_v1, %v886_v59  ;;  %v887_v6 = vmul.f32 %v826_v47, %v1843_v7  ;;  %v856_v23 = vrot.slane %v826_v47, %v1858_v18  ;;  %v911_v63 = vadd.f32 %v910_v17, %v909_v2 }
 0x469   : > { %v906_v33 = vrot.slane %v905_v46, 1 }
 0x46a   : > { %v920_v14 = vrot.slane %v887_v6, 4  ;;  %v916_v7 = vrot.slane %v915_v4, 2  ;;  %v869_v28 = vsel %vm597_vm4, %v856_v23, %v868_v26  ;;  %v912_v37 = vrot.slane %v911_v63, 1 }
 0x46b   : > { %v829_v22 = vpop.permute.xlu0 %828  ;;  %v907_v49 = vadd.f32 %v906_v33, %v905_v46 }
 0x46c   : > { %v921_v25 = vadd.f32 %v920_v14, %v887_v6  ;;  %v888_v31 = vmul.f32 %v829_v22, %v1848_v10  ;;  %v860_v20 = vrot.slane %v829_v22, %v1858_v18  ;;  %v917_v5 = vadd.f32 %v916_v7, %v915_v4  ;;  %v430_v6 = vpop.f32.mrf.mxu0 }
 0x46d   : > { %v913_v53 = vadd.f32 %v912_v37, %v911_v63  ;;  %v963_v59 = vsel %vm591_vm1, %v907_v49, %v962_v56 }
 0x46e   : > { %v922_v48 = vrot.slane %v921_v25, 2  ;;  %v926_v24 = vrot.slane %v888_v31, 4  ;;  %v870_v29 = vsel %vm599_vm5, %v860_v20, %v869_v28  ;;  %v918_v40 = vrot.slane %v917_v5, 1 }
 0x46f   : > { %v832_v27 = vpop.permute.xlu0 %831  ;;  %v964_v1 = vsel %vm593_vm2, %v913_v53, %v963_v59 }
 0x470   : > { %v927_v10 = vadd.f32 %v926_v24, %v888_v31  ;;  %v864_v32 = vrot.slane %v832_v27, %v1858_v18  ;;  %v923_v11 = vadd.f32 %v922_v48, %v921_v25  ;;  %v889_v30 = vmul.f32 %v832_v27, %v1853_v13 }
 0x471   : > { %v919_v13 = vadd.f32 %v918_v40, %v917_v5 }
 0x472   : > { %v928_v34 = vrot.slane %v927_v10, 2  ;;  %v871_v35 = vsel %vm601_vm6, %v864_v32, %v870_v29  ;;  %v932_v39 = vrot.slane %v889_v30, 4  ;;  %v924_v44 = vrot.slane %v923_v11, 1 }
 0x473   : > { %873 = vst.msk [vmem:[%s320_s9] sm:$0xff] %vm604_vm7, %v871_v35  ;;  %v965_v58 = vsel %vm595_vm3, %v919_v13, %v964_v1 }
 0x474   : > { %v929_v41 = vadd.f32 %v928_v34, %v927_v10  ;;  %v933_v18 = vadd.f32 %v932_v39, %v889_v30  ;;  %v925_v57 = vadd.f32 %v924_v44, %v923_v11 }
 0x476   : > { %v930_v50 = vrot.slane %v929_v41, 1  ;;  %v934_v55 = vrot.slane %v933_v18, 2  ;;  %v966_v2 = vsel %vm597_vm4, %v925_v57, %v965_v58 }
 0x478   : > { %v935_v0 = vadd.f32 %v934_v55, %v933_v18  ;;  %v931_v60 = vadd.f32 %v930_v50, %v929_v41 }
 0x47a   : > { %v936_v61 = vrot.slane %v935_v0, 1  ;;  %v967_v47 = vsel %vm599_vm5, %v931_v60, %v966_v2 }
 0x47c   : > { %v937_v52 = vadd.f32 %v936_v61, %v935_v0 }
 0x47e   : > { %v968_v4 = vsel %vm601_vm6, %v937_v52, %v967_v47 }
 0x47f   : > { %1271 = vmatmul.mubr.f32.vlgmr.msra.gmra.mxu1 %v968_v4 }
 0x53f   : > { %v1036_v62 = vpop.f32.mrf.mxu1 }
 0x540   : > { %v1037_v8 = vadd.f32 %v1036_v62, %v430_v6 }
 0x541   : > { %v1272_v9 = vpop.f32.mrf.mxu1 }
 0x542   : > { %1373 = vtanh.f32 %v1037_v8 }
 0x54f   : > { %v1374_v3 = vpop.eup %1373 }
 0x550   : > { %1041 = vst [vmem:[%s309_s14] sm:$0xff] %v1374_v3 }
 0x551   : > { %1496 = shalt.err (!%p1493_p2)
}
 0x552   : > { %s1497_s10 = scalar_lea.hbm %s1998_s15, 128  ;;  %s1501_s16 = scalar_lea.hbm %s2039_s4, 256 }
 0x553   : > { %p1498_p0 = scmp.ne.s32.totalorder %s1998_s15, %s1497_s10  ;;  %p1502_p10 = scmp.lt.s32.totalorder %s1998_s15, %s2039_s4 }
 0x554   : > { %p1503_p6 = scmp.lt.s32.totalorder %s1501_s16, %s1497_s10 }
 0x555   : > { %p1499_p8 = pnand %p1498_p0, %p2063_p9 }
 0x556   : > { %p1504_p12 = por %p1503_p6, %p1502_p10 }
 0x557   : > { %p1500_p11 = pneg %p1499_p8 }
 0x559   : > { %p1505_p3 = pnand %p1504_p12, %p1500_p11 }
 0x55b   : > { %1508 = shalt.err (!%p1505_p3)
}
 0x55c   : > { %1285 = dma.vmem_to_hbm [thread:$0]  (%p2063_p9), %s1061_s0, 128, %s1998_s15, %s1043_s26  }
 0x55d PF: > { %s1075_s9 = sand.u32 1, %s1547_s18   ;;  %p2064_p13 = scmp.ne.s32.totalorder %s2048_s25, 0 }
 0x55e   : > { %p2065_p5 = scmp.ge.s32.totalorder %s1559_s21, 2  ;;  %s1076_s11 = scalar_lea.sflag [#allocation4], %s1075_s9 }
 0x560   : > { %p1302_p1 = pnand %p2065_p5, %p2064_p13 }
 0x562   : > { %p1303_p4 = pneg %p1302_p1 }
 0x564   : > { %1542 = dma.done.wait (%p1303_p4), %s1076_s11, 128  }
 0x565   : > { %1544 = vsyncadd (%p1303_p4), %s1076_s11, 4294967168  ;;  %p23_p7 = scmp.ge.s32.totalorder %s1679_s17, 4   ;;  %s2066_s18 = smov %s1551_s19 }
 0x566   : > { %s2067_s19 = smov %s1555_s20  ;;  %s2068_s20 = smov %s1688_s28 }
 0x567   : > { %s2069_s21 = smov %s1679_s17  ;;  %25 = sbr.rel (!%p23_p7) target bundleno = 10 (0xa), region = 114 }
 0x56c   :  { %1088 = vsyncpa [#allocation3], 1 }
 0x56d   :  { %1090 = vsyncpa [#allocation3 + $0x1], 1 }
 0x56e   :  { %1091 = vsyncpa [#allocation6], 1 }
 0x56f   :  { %1093 = vsyncpa [#allocation6 + $0x1], 1 }
 0x570   :  { %1094 = vsyncpa [#allocation9], 1 }
 0x571   :  { %1095 = vsyncpa [#allocation4], 1 }
 0x572   :  { %1097 = vsyncpa [#allocation4 + $0x1], 1 }

</bundles_post_ra>
